<compile_context>
chip_gen: v7x
topology: tpu7x:2x2x1
jax: 0.10.0
libtpu: 0.0.40
codegen_flags: <defaults>
</compile_context>

<pallas_src>
import jax
import jax.numpy as jnp
from jax.experimental import pallas as pl
from jax.experimental.pallas import tpu as pltpu


def _discriminator_kernel(x_ref, w1_ref, b1_ref, w2_ref, b2_ref, w3_ref, b3_ref,
                          o_ref):
    # h1 = relu(x @ W1 + b1)   (bf16 or f32 operands, f32 accumulation)
    h1 = jnp.dot(x_ref[...], w1_ref[...], preferred_element_type=jnp.float32)
    h1 = jnp.maximum(h1 + b1_ref[...], 0.0)
    # h2 = relu(h1 @ W2 + b2)
    h2 = jnp.dot(h1.astype(w2_ref.dtype), w2_ref[...],
                 preferred_element_type=jnp.float32)
    h2 = jnp.maximum(h2 + b2_ref[...], 0.0)
    # out = h2 @ W3 + b3
    out = jnp.dot(h2.astype(w3_ref.dtype), w3_ref[...],
                  preferred_element_type=jnp.float32)
    o_ref[...] = (out + b3_ref[...]).astype(o_ref.dtype)


def _choose_tile_b(B, *, max_tile=1024, min_tile=16):
    """Pick a batch tile: multiple of 16 rows, capped at 1024, and (when the
    batch allows it) at least 2 grid steps so both v7x TensorCores get work."""
    if B <= min_tile:
        return min_tile
    t = min(max_tile, pl.cdiv(B, 2))
    t = max(min_tile, (t // min_tile) * min_tile)
    return t


def discriminator_forward(x, params, *, tile_b=None, use_bf16=True):
    """x: (B, out_size) float32. params: dict of w1,b1,w2,b2,w3,b3.

    Returns (B, in_size) float32.
    """
    B, feat_in = x.shape
    in_size = params["w3"].shape[1]

    compute_dtype = jnp.bfloat16 if use_bf16 else x.dtype
    xc = x.astype(compute_dtype)
    w1 = params["w1"].astype(compute_dtype)
    w2 = params["w2"].astype(compute_dtype)
    w3 = params["w3"].astype(compute_dtype)
    # Biases stay f32: they are added to the f32 accumulator.
    b1 = params["b1"].astype(jnp.float32)
    b2 = params["b2"].astype(jnp.float32)
    b3 = params["b3"].astype(jnp.float32)

    if tile_b is None:
        tile_b = _choose_tile_b(B)

    # Pad the batch up to a tile multiple; extra rows are sliced off afterwards.
    n_tiles = pl.cdiv(B, tile_b)
    B_pad = n_tiles * tile_b
    if B_pad != B:
        xc = jnp.pad(xc, ((0, B_pad - B), (0, 0)))

    x_spec = pl.BlockSpec((tile_b, feat_in), lambda i: (i, 0))
    o_spec = pl.BlockSpec((tile_b, in_size), lambda i: (i, 0))
    # Weights/biases: full array, constant block index -> DMA'd once, resident.
    full = lambda a: pl.BlockSpec(a.shape, lambda i: (0,) * a.ndim)

    out = pl.pallas_call(
        _discriminator_kernel,
        out_shape=jax.ShapeDtypeStruct((B_pad, in_size), jnp.float32),
        grid=(n_tiles,),
        in_specs=[x_spec, full(w1), full(b1), full(w2), full(b2),
                  full(w3), full(b3)],
        out_specs=o_spec,
        compiler_params=pltpu.CompilerParams(
            dimension_semantics=("parallel",)),
    )(xc, w1, b1, w2, b2, w3, b3)

    return out[:B] if B_pad != B else out


def init_params(key, in_size, hid_size, out_size, dtype=jnp.float32):
    """Deterministic init mirroring torch.nn.Linear's U(-1/sqrt(fan_in), 1/sqrt(fan_in)).

    Weights are stored as (in_features, out_features) = W_pt.T.
    """
    ks = jax.random.split(key, 6)

    def lin(kw, kb, fan_in, fan_out):
        bound = 1.0 / jnp.sqrt(fan_in)
        w = jax.random.uniform(kw, (fan_in, fan_out), dtype, -bound, bound)
        b = jax.random.uniform(kb, (1, fan_out), dtype, -bound, bound)
        return w, b

    w1, b1 = lin(ks[0], ks[1], out_size, hid_size)   # lin1: out_size -> hid_size
    w2, b2 = lin(ks[2], ks[3], hid_size, hid_size)   # lin2: hid_size -> hid_size
    w3, b3 = lin(ks[4], ks[5], hid_size, in_size)    # lin3: hid_size -> in_size
    return dict(w1=w1, b1=b1, w2=w2, b2=b2, w3=w3, b3=b3)


def reference_forward(x, p):
    h1 = jnp.maximum(x @ p["w1"] + p["b1"], 0.0)
    h2 = jnp.maximum(h1 @ p["w2"] + p["b2"], 0.0)
    return h2 @ p["w3"] + p["b3"]


if __name__ == "__main__":
    in_size, hid_size, out_size = 16, 32, 24
    batch = 40   # not a tile multiple -> exercises padding + multi-step grid

    key = jax.random.PRNGKey(0)
    kx, kp = jax.random.split(key)
    x = jax.random.normal(kx, (batch, out_size), jnp.float32)
    params = init_params(kp, in_size, hid_size, out_size)

    ref = reference_forward(x, params)

    # Fast bf16 path (default): bf16 operands on the MXU, f32 accumulation.
    out_bf16 = jax.block_until_ready(discriminator_forward(x, params))
    assert out_bf16.shape == (batch, in_size)
    assert out_bf16.dtype == jnp.float32
    assert jnp.allclose(out_bf16, ref, atol=5e-2, rtol=5e-2)

    # f32 path: exact parity with the PyTorch (f32) reference.
    out_f32 = jax.block_until_ready(
        discriminator_forward(x, params, use_bf16=False))
    assert jnp.allclose(out_f32, ref, atol=1e-5, rtol=1e-5)

    print("KERNEL_OK")
</pallas_src>

<mosaic_0001>
module attributes {stable_mosaic.version = 11 : i64} {
  func.func @_discriminator_kernel(%arg0: i32, %arg1: memref<16x24xbf16, #tpu.memory_space<vmem>>, %arg2: memref<24x32xbf16, #tpu.memory_space<vmem>>, %arg3: memref<1x32xf32, #tpu.memory_space<vmem>>, %arg4: memref<32x32xbf16, #tpu.memory_space<vmem>>, %arg5: memref<1x32xf32, #tpu.memory_space<vmem>>, %arg6: memref<32x16xbf16, #tpu.memory_space<vmem>>, %arg7: memref<1x16xf32, #tpu.memory_space<vmem>>, %arg8: memref<16x16xf32, #tpu.memory_space<vmem>>) attributes {dimension_semantics = [#tpu.dimension_semantics<parallel>], iteration_bounds = array<i64: 3>, scalar_prefetch = 0 : i64, scratch_operands = 0 : i64, tpu.core_type = #tpu.core_type<tc>, window_params = [{transform_indices = @transform_0, window_bounds = array<i64: 16, 24>}, {pipeline_mode = #tpu.pipeline_mode<synchronous>, transform_indices = @transform_1, window_bounds = array<i64: 24, 32>}, {pipeline_mode = #tpu.pipeline_mode<synchronous>, transform_indices = @transform_2, window_bounds = array<i64: 1, 32>}, {pipeline_mode = #tpu.pipeline_mode<synchronous>, transform_indices = @transform_3, window_bounds = array<i64: 32, 32>}, {pipeline_mode = #tpu.pipeline_mode<synchronous>, transform_indices = @transform_4, window_bounds = array<i64: 1, 32>}, {pipeline_mode = #tpu.pipeline_mode<synchronous>, transform_indices = @transform_5, window_bounds = array<i64: 32, 16>}, {pipeline_mode = #tpu.pipeline_mode<synchronous>, transform_indices = @transform_6, window_bounds = array<i64: 1, 16>}, {transform_indices = @transform_7, window_bounds = array<i64: 16, 16>}]} {
    %c0 = arith.constant 0 : index
    %c0_0 = arith.constant 0 : index
    %0 = vector.load %arg1[%c0, %c0_0] : memref<16x24xbf16, #tpu.memory_space<vmem>>, vector<16x24xbf16>
    %c0_1 = arith.constant 0 : index
    %c0_2 = arith.constant 0 : index
    %1 = vector.load %arg2[%c0_1, %c0_2] : memref<24x32xbf16, #tpu.memory_space<vmem>>, vector<24x32xbf16>
    %cst = arith.constant dense<0.000000e+00> : vector<16x32xf32>
    %2 = tpu.matmul %0, %1, %cst {dimension_numbers = #tpu.dot_dimension_numbers<[1], [0], [0], [1], [0, 0, 1, 1], [], []>} : vector<16x24xbf16>, vector<24x32xbf16>, vector<16x32xf32> -> vector<16x32xf32>
    %c0_3 = arith.constant 0 : index
    %c0_4 = arith.constant 0 : index
    %3 = vector.load %arg3[%c0_3, %c0_4] : memref<1x32xf32, #tpu.memory_space<vmem>>, vector<1x32xf32>
    %4 = vector.broadcast %3 : vector<1x32xf32> to vector<16x32xf32>
    %5 = arith.addf %2, %4 : vector<16x32xf32>
    %cst_5 = arith.constant 0.000000e+00 : f32
    %6 = vector.broadcast %cst_5 : f32 to vector<16x32xf32>
    %7 = arith.maximumf %5, %6 : vector<16x32xf32>
    %8 = arith.truncf %7 : vector<16x32xf32> to vector<16x32xbf16>
    %c0_6 = arith.constant 0 : index
    %c0_7 = arith.constant 0 : index
    %9 = vector.load %arg4[%c0_6, %c0_7] : memref<32x32xbf16, #tpu.memory_space<vmem>>, vector<32x32xbf16>
    %cst_8 = arith.constant dense<0.000000e+00> : vector<16x32xf32>
    %10 = tpu.matmul %8, %9, %cst_8 {dimension_numbers = #tpu.dot_dimension_numbers<[1], [0], [0], [1], [0, 0, 1, 1], [], []>} : vector<16x32xbf16>, vector<32x32xbf16>, vector<16x32xf32> -> vector<16x32xf32>
    %c0_9 = arith.constant 0 : index
    %c0_10 = arith.constant 0 : index
    %11 = vector.load %arg5[%c0_9, %c0_10] : memref<1x32xf32, #tpu.memory_space<vmem>>, vector<1x32xf32>
    %12 = vector.broadcast %11 : vector<1x32xf32> to vector<16x32xf32>
    %13 = arith.addf %10, %12 : vector<16x32xf32>
    %cst_11 = arith.constant 0.000000e+00 : f32
    %14 = vector.broadcast %cst_11 : f32 to vector<16x32xf32>
    %15 = arith.maximumf %13, %14 : vector<16x32xf32>
    %16 = arith.truncf %15 : vector<16x32xf32> to vector<16x32xbf16>
    %c0_12 = arith.constant 0 : index
    %c0_13 = arith.constant 0 : index
    %17 = vector.load %arg6[%c0_12, %c0_13] : memref<32x16xbf16, #tpu.memory_space<vmem>>, vector<32x16xbf16>
    %cst_14 = arith.constant dense<0.000000e+00> : vector<16x16xf32>
    %18 = tpu.matmul %16, %17, %cst_14 {dimension_numbers = #tpu.dot_dimension_numbers<[1], [0], [0], [1], [0, 0, 1, 1], [], []>} : vector<16x32xbf16>, vector<32x16xbf16>, vector<16x16xf32> -> vector<16x16xf32>
    %c0_15 = arith.constant 0 : index
    %c0_16 = arith.constant 0 : index
    %19 = vector.load %arg7[%c0_15, %c0_16] : memref<1x16xf32, #tpu.memory_space<vmem>>, vector<1x16xf32>
    %20 = vector.broadcast %19 : vector<1x16xf32> to vector<16x16xf32>
    %21 = arith.addf %18, %20 : vector<16x16xf32>
    %c0_17 = arith.constant 0 : index
    %c0_18 = arith.constant 0 : index
    %22 = vector.load %arg8[%c0_17, %c0_18] : memref<16x16xf32, #tpu.memory_space<vmem>>, vector<16x16xf32>
    tpu.vector_store %arg8[%c0_17, %c0_18], %21 {strides = array<i32>} : memref<16x16xf32, #tpu.memory_space<vmem>>, vector<16x16xf32>,
    return
  }
  func.func @transform_0(%arg0: i32) -> (i32, i32) {
    %c0_i32 = arith.constant 0 : i32
    %c0_i32_0 = arith.constant 0 : i32
    return %arg0, %c0_i32 : i32, i32
  }
  func.func @transform_1(%arg0: i32) -> (i32, i32) {
    %c0_i32 = arith.constant 0 : i32
    %c0_i32_0 = arith.constant 0 : i32
    %c0_i32_1 = arith.constant 0 : i32
    return %c0_i32, %c0_i32_0 : i32, i32
  }
  func.func @transform_2(%arg0: i32) -> (i32, i32) {
    %c0_i32 = arith.constant 0 : i32
    %c0_i32_0 = arith.constant 0 : i32
    %c0_i32_1 = arith.constant 0 : i32
    return %c0_i32, %c0_i32_0 : i32, i32
  }
  func.func @transform_3(%arg0: i32) -> (i32, i32) {
    %c0_i32 = arith.constant 0 : i32
    %c0_i32_0 = arith.constant 0 : i32
    %c0_i32_1 = arith.constant 0 : i32
    return %c0_i32, %c0_i32_0 : i32, i32
  }
  func.func @transform_4(%arg0: i32) -> (i32, i32) {
    %c0_i32 = arith.constant 0 : i32
    %c0_i32_0 = arith.constant 0 : i32
    %c0_i32_1 = arith.constant 0 : i32
    return %c0_i32, %c0_i32_0 : i32, i32
  }
  func.func @transform_5(%arg0: i32) -> (i32, i32) {
    %c0_i32 = arith.constant 0 : i32
    %c0_i32_0 = arith.constant 0 : i32
    %c0_i32_1 = arith.constant 0 : i32
    return %c0_i32, %c0_i32_0 : i32, i32
  }
  func.func @transform_6(%arg0: i32) -> (i32, i32) {
    %c0_i32 = arith.constant 0 : i32
    %c0_i32_0 = arith.constant 0 : i32
    %c0_i32_1 = arith.constant 0 : i32
    return %c0_i32, %c0_i32_0 : i32, i32
  }
  func.func @transform_7(%arg0: i32) -> (i32, i32) {
    %c0_i32 = arith.constant 0 : i32
    %c0_i32_0 = arith.constant 0 : i32
    return %arg0, %c0_i32 : i32, i32
  }
}

</mosaic_0001>

<bundles_post_ra>
// kernel: tpu_custom_call.1
= control target key start
LH: loop header
LB: loop body
LE: loop exit
PB: predicated region body
PF: predicated region fallthrough
CT: control target
= control target key end

     0   :  { %s682_s24 = smov 0   ;;  %s732_s0 = inlined_call_operand.vmem [shape: bf16[48,24], index: 0, kind: input, shape index: {}]   ;;  %s733_s1 = inlined_call_operand.vmem [shape: bf16[24,32], index: 1, kind: input, shape index: {}]   ;;  %s734_s2 = inlined_call_operand.vmem [shape: f32[1,32], index: 2, kind: input, shape index: {}]   ;;  %s735_s3 = inlined_call_operand.vmem [shape: bf16[32,32], index: 3, kind: input, shape index: {}]   ;;  %s736_s4 = inlined_call_operand.vmem [shape: f32[1,32], index: 4, kind: input, shape index: {}]   ;;  %s737_s5 = inlined_call_operand.vmem [shape: bf16[32,16], index: 5, kind: input, shape index: {}]   ;;  %s738_s6 = inlined_call_operand.vmem [shape: f32[1,16], index: 6, kind: input, shape index: {}]   ;;  %s739_s7 = inlined_call_operand.vmem [shape: f32[48,16], index: 7, kind: output, shape index: {}]  }
   0x1 LB: > { %s558_s25 = sadd.s32 4294967295, %s638_s24   ;;  %p562_p0 = scmp.ge.s32.totalorder %s638_s24, 1  ;;  %s638_s24 = sphi %s682_s24, %s17_s24  }
   0x2   : > { %p238_p1 = scmp.lt.s32.totalorder %s638_s24, 4 }
   0x4   : > { %p239_p2 = pnand %p562_p0, %p238_p1 }
   0x5   : > { %v625_v0 = vld [vmem:[%s733_s1] sm:$0xff] (!%p239_p2)   ;;  %v640_v1 = vmov (!%p239_p2), 0.0   ;;  %v626_v2 = vld [vmem:[%s733_s1 + $0x8] ss:$0 sps:$4 sm:$0xff] (!%p239_p2)   ;;  %vm313_vm0 = vcmask (!%p239_p2), 1043456   ;;  %vm641_vm1 = vmmov (!%p239_p2), 0  }
   0x6   : > { %242 = sbr.rel (%p239_p2) target bundleno = 674 (0x2a2), region = 48  ;;  %591 = vmatprep.subr.bf16.mxu0 (!%p239_p2), %v640_v1  ;;  %599 = vmatprep.subr.bf16.mxu1 (!%p239_p2), %v640_v1  ;;  %s563_s30 = sshll.u32 (!%p239_p2), %s558_s25, 1  ;;  %v315_v3 = vsel (!%p239_p2), %vm313_vm0, %v626_v2, 0  ;;  %vm309_vm2 = vcmask (!%p239_p2), 195584   ;;  %v628_v5 = vld [vmem:[%s735_s3] sm:$0xff] (!%p239_p2)   ;;  %v629_v6 = vld [vmem:[%s735_s3 + $0x8] sm:$0xff] (!%p239_p2)  }
   0x7   : > { %592 = vmatpush3.bf16.msra.mxu0 (!%p239_p2), %v625_v0  ;;  %595 = vmatprep.mubr.msk.bf16.mxu0 (!%p239_p2), %vm641_vm1, %v640_v1  ;;  %p271_p3 = scmp.lt.s32.totalorder (!%p239_p2), %s563_s30, 5  ;;  %v567_v7 = vld [vmem:[%s734_s2] ss:$0 sm:$0xff] (!%p239_p2)  ;;  %vm384_vm3 = vcmask (!%p239_p2), 261120   ;;  %v631_v18 = vld [vmem:[%s737_s5 + $0x8] sm:$0xff] (!%p239_p2)   ;;  %vm499_vm4 = vcmask (!%p239_p2), 130048  }
   0x8   : > { %593 = vmatprep.subr.bf16.mxu0 (!%p239_p2), %v640_v1  ;;  %603 = vmatprep.mubr.msk.bf16.mxu1 (!%p239_p2), %vm641_vm1, %v640_v1  ;;  %v630_v17 = vld [vmem:[%s737_s5] sm:$0xff] (!%p239_p2)  }
   0x9   : > { %600 = vmatpush3.bf16.msra.mxu1 (!%p239_p2), %v628_v5  ;;  %v572_v19 = vld [vmem:[%s736_s4] ss:$0 sm:$0xff] (!%p239_p2) }
   0xa   : > { %601 = vmatprep.subr.bf16.mxu1 (!%p239_p2), %v640_v1  ;;  %v576_v29 = vld [vmem:[%s738_s6] ss:$0 sm:$0xff] (!%p239_p2) }
   0xb   : > { %594 = vmatpush3.bf16.msra.mxu0 (!%p239_p2), %v315_v3 }
   0xc   : > { %607 = vmatprep.subr.bf16.mxu0 (!%p239_p2), %v640_v1 }
   0xd   : > { %s741_s30 = smov (!%p271_p3, %s563_s30), 5  ;;  %602 = vmatpush3.bf16.msra.mxu1 %v629_v6 }
   0xe   : > { %s564_s8 = sshll.u32 %s741_s30, 2  ;;  %s566_s25 = sshll.u32 %s741_s30, 3 }
   0xf   : > { %s274_s11 = scalar_lea.vmem %s732_s0, %s564_s8  ;;  %s280_s8 = scalar_lea.vmem %s739_s7, %s566_s25 }
  0x10   : > { %v627_v4 = vld [vmem:[%s274_s11] sm:$0xff]  }
  0x11   : > { %596 = vmatmul.mubr.msk.bf16.vlgmr.msra.gmra.mrb[0].mxu0 %vm309_vm2, %v627_v4 }
  0x12   : > { %611 = vmatprep.mubr.msk.bf16.mxu0 %vm641_vm1, %v640_v1  ;;  %608 = vmatpush3.bf16.msra.mxu0 %v630_v17 }
  0x13   : > { %609 = vmatprep.subr.bf16.mxu0 %v640_v1 }
  0x16   : > { %610 = vmatpush3.bf16.msra.mxu0 %v631_v18 }
  0xe4   : > { %v351_v8 = vpop.f32.mrb[0].mxu0 }
  0xe5   : > { %v352_v9 = vadd.f32 %v567_v7, %v351_v8  ;;  %v597_v10 = vpop.f32.mrb[1].mxu0 }
  0xe6   : > { %v354_v11 = vpop.f32.mrb[2].mxu0 }
  0xe7   : > { %v355_v12 = vadd.f32 %v567_v7, %v354_v11  ;;  %v598_v13 = vpop.f32.mrb[3].mxu0  ;;  %v358_v14 = vmax.f32 %v352_v9, 0.0 }
  0xe9   : > { %v359_v15 = vmax.f32 %v355_v12, 0.0 }
  0xeb   : > { %v360_v16 = vpack.c.bf16 %v359_v15, %v358_v14 }
  0xed   : > { %604 = vmatmul.mubr.msk.bf16.vlgmr.msra.gmra.mrb[0].mxu1 %vm384_vm3, %v360_v16 }
 0x1c0   : > { %v422_v20 = vpop.f32.mrb[0].mxu1 }
 0x1c1   : > { %v423_v21 = vadd.f32 %v572_v19, %v422_v20  ;;  %v605_v22 = vpop.f32.mrb[1].mxu1 }
 0x1c2   : > { %v425_v23 = vpop.f32.mrb[2].mxu1 }
 0x1c3   : > { %v426_v24 = vadd.f32 %v572_v19, %v425_v23  ;;  %v606_v25 = vpop.f32.mrb[3].mxu1  ;;  %v429_v26 = vmax.f32 %v423_v21, 0.0 }
 0x1c5   : > { %v430_v27 = vmax.f32 %v426_v24, 0.0 }
 0x1c7   : > { %v431_v28 = vpack.c.bf16 %v430_v27, %v429_v26 }
 0x1c9   : > { %612 = vmatmul.mubr.msk.bf16.vlgmr.msra.gmra.mrb[4].mxu0 %vm384_vm3, %v431_v28 }
 0x29c   : > { %v492_v30 = vpop.f32.mrb[4].mxu0 }
 0x29d   : > { %v493_v31 = vadd.f32 %v576_v29, %v492_v30  ;;  %v613_v32 = vpop.f32.mrb[5].mxu0 }
 0x29e   : > { %v495_v33 = vpop.f32.mrb[6].mxu0 }
 0x29f   : > { %500 = vst.msk [vmem:[%s280_s8] sm:$0xff] %vm499_vm4, %v493_v31  ;;  %v496_v34 = vadd.f32 %v576_v29, %v495_v33  ;;  %v614_v35 = vpop.f32.mrb[7].mxu0 }
 0x2a1   : > { %501 = vst.msk [vmem:[%s280_s8 + $0x8] sm:$0xff] %vm499_vm4, %v496_v34 }
 0x2a2 PF: > { %s17_s24 = sadd.s32 1, %s638_s24  }
 0x2a3   : > { %p14_p4 = scmp.ge.s32.totalorder %s17_s24, 5  }
 0x2a5   :  { %16 = sbr.rel (!%p14_p4) target bundleno = 1 (0x1), region = 78 }

</bundles_post_ra>
